<compile_context>
chip_gen: v5e
topology: v5e:2x2
jax: 0.10.0
libtpu: 0.0.40
codegen_flags: <defaults>
</compile_context>

<pallas_src>
import functools
import math

import jax
import jax.numpy as jnp
from jax.experimental import pallas as pl
from jax.experimental.pallas import tpu as pltpu


def _cluster_kernel(cen_ref, pxcn_ref, px2_ref, tok_ref, sp_ref,
                    sp_out_ref, lbl_ref,
                    spT_ref, spbf_ref, sp2_ref, num_ref, den_ref, *,
                    n_iters: int, temperature: float, r: int,
                    num_spixels: int, n_valid: int, tile_n: int, has_pad: bool):
    # cen_ref : (1, S, C) f32      pxcn_ref : (1, C, tn) bf16
    # px2_ref : (1, 1, tn) f32     tok_ref  : (2, tn) i32  (token (w,h) grid coords)
    # sp_ref  : (S, 2) i32         (superpixel (w,h) minus r -> window lower bound)
    # sp_out  : (1, S, C) f32      lbl_ref  : (1, 1, tn) i32
    # scratch : spT (S,C) f32, spbf (S,C) bf16, sp2 (S,1) f32, num (S,C) f32, den (S,1) f32
    it = pl.program_id(1)
    nk = pl.program_id(2)
    last_nk = pl.num_programs(2) - 1

    # per-batch init of the centroid state (scratch persists across grid steps)
    @pl.when(jnp.logical_and(it == 0, nk == 0))
    def _():
        c = cen_ref[0].astype(jnp.float32)
        spT_ref[...] = c
        spbf_ref[...] = c.astype(jnp.bfloat16)
        sp2_ref[...] = jnp.sum(c * c, axis=1, keepdims=True)

    # zero accumulators at the start of every update sweep over the token chunks
    @pl.when(jnp.logical_and(it < n_iters, nk == 0))
    def _():
        num_ref[...] = jnp.zeros_like(num_ref)
        den_ref[...] = jnp.zeros_like(den_ref)

    px_cn = pxcn_ref[0]                                    # (C, tn) bf16
    px2 = px2_ref[0]                                       # (1, tn) f32 (exact norms)

    # pairwise_dist: |px|^2 + |sp|^2 - 2 * sp.px   (bf16 MXU operands, f32 acc;
    # the bf16 centroids and their squared norms are cached in scratch)
    cross = jnp.dot(spbf_ref[...], px_cn,
                    preferred_element_type=jnp.float32)    # (S, tn) f32
    dist = px2 + sp2_ref[...] - 2.0 * cross                # (S, tn) f32

    # ---- clustering update: first n_iters sweeps only -------------------------
    @pl.when(it < n_iters)
    def _():
        # window mask: unsigned range check against precomputed lower bounds
        tok = tok_ref[...]                                 # (2, tn) i32
        spc = sp_ref[...]                                  # (S, 2) i32 (coord - r)
        win = jnp.uint32(2 * r)
        dw = pltpu.bitcast(tok[0:1, :] - spc[:, 0:1], jnp.uint32)   # (S, tn)
        dh = pltpu.bitcast(tok[1:2, :] - spc[:, 1:2], jnp.uint32)
        in_win = (dw <= win) & (dh <= win)

        logits = jnp.where(in_win, dist * jnp.float32(-temperature),
                           jnp.float32(-1e30))
        logits = logits - jnp.max(logits, axis=0, keepdims=True)
        e = jnp.exp(logits)
        inv = pl.reciprocal(jnp.sum(e, axis=0, keepdims=True), approx=True)
        aff = e * inv                                      # softmax over S, (S, tn)

        if has_pad:
            # zero out padded token columns so they add no mass to num/den
            col = nk * tile_n + jax.lax.broadcasted_iota(jnp.int32, (1, tile_n), 1)
            aff = aff * (col < n_valid).astype(aff.dtype)

        # weighted token sums via NT contraction (tn with tn) on the single
        # (C, tn) stream -> no second token layout in HBM
        num_ref[...] += jax.lax.dot_general(
            aff.astype(jnp.bfloat16), px_cn,
            dimension_numbers=(((1,), (1,)), ((), ())),
            preferred_element_type=jnp.float32)            # (S, C)
        den_ref[...] += jnp.sum(aff, axis=1, keepdims=True)  # (S, 1)

        # end of a full sweep over N -> centroid update (exact divide; refresh
        # the cached bf16 centroids + squared norms once per sweep)
        @pl.when(nk == last_nk)
        def _():
            new_sp = num_ref[...] / jnp.maximum(den_ref[...], 1e-16)
            spT_ref[...] = new_sp
            spbf_ref[...] = new_sp.astype(jnp.bfloat16)
            sp2_ref[...] = jnp.sum(new_sp * new_sp, axis=1, keepdims=True)

    # ---- final sweep: hard labels from the UNMASKED distance + feature out ----
    @pl.when(it == n_iters)
    def _():
        min_v = jnp.min(dist, axis=0, keepdims=True)
        s_iota = jax.lax.broadcasted_iota(jnp.int32, dist.shape, 0)
        lbl_ref[0] = jnp.min(jnp.where(dist == min_v, s_iota, num_spixels),
                             axis=0, keepdims=True).astype(jnp.int32)

        @pl.when(nk == last_nk)
        def _():
            sp_out_ref[0] = spT_ref[...].astype(sp_out_ref.dtype)


def _round_up(x: int, m: int) -> int:
    return ((x + m - 1) // m) * m


def _vmem_budget(S: int, C: int, tn: int) -> int:
    """Heuristic per-step scoped-VMEM estimate (double-buffered blocks + scratch
    + live (S, tn) temporaries), with slack."""
    s8 = max(_round_up(S, 8), 8)
    c128 = max(_round_up(C, 128), 128)
    blk_in = S * C * 4 + C * tn * 2 + tn * 4 + 2 * tn * 4 + S * 2 * 4
    blk_out = S * C * 4 + tn * 4
    scratch = S * C * 10 + S * 8
    temps = 10 * s8 * tn * 4 + 2 * s8 * c128 * 4
    return 2 * (blk_in + blk_out) + scratch + temps + (4 << 20)


def _choose_tiling(N: int, want: int, S: int, C: int, cap: int):
    """Pad N to a multiple of 128 and pick the largest 128-multiple tile that
    divides the padded length and fits the VMEM cap (never falls back to an
    untiled N)."""
    n_pad = _round_up(max(N, 128), 128)
    t = max(128, min((max(want, 128) // 128) * 128, n_pad))
    while t > 128:
        if n_pad % t == 0 and _vmem_budget(S, C, t) <= cap:
            break
        t -= 128
    return t, n_pad


def token_clustering_block(pixel_features, *, num_spixels, n_iters=2,
                           temperature=0.01, window_size=3, tile_n=None):
    """pixel_features: (B, C, H, W).  Returns (spixel_feats (B,S,C) f32,
    hard_labels (B,N) int32, (num_spixels_height, num_spixels_width))."""
    if isinstance(num_spixels, tuple):
        nsh, nsw = num_spixels
    else:
        x = int(math.sqrt(num_spixels))
        assert x * x == num_spixels
        nsh = nsw = x
    assert window_size % 2 == 1
    r = int(window_size // 2)
    n_iters = int(n_iters)

    B, C, H, W = pixel_features.shape
    S = nsh * nsw
    N = H * W

    # ---- generation-aware VMEM cap / tile choice ------------------------------
    try:
        info = pltpu.get_tpu_info()
        vmem_total = int(getattr(info, "vmem_capacity_bytes", 64 * 1024 * 1024))
    except Exception:
        vmem_total = 64 * 1024 * 1024          # conservative (v7x-safe) fallback
    if vmem_total >= 100 * 1024 * 1024:        # 128-MiB parts (v5e/v6e)
        vmem_cap = vmem_total - (20 << 20)
        default_tile = 2048
    else:                                      # 64-MiB parts (v7x)
        vmem_cap = min(52 << 20, max(vmem_total - (8 << 20), 16 << 20))
        default_tile = 2048
    want = default_tile if tile_n is None else int(tile_n)

    tn, n_pad = _choose_tiling(N, want, S, C, vmem_cap)
    n_chunks = n_pad // tn
    has_pad = (n_pad != N)

    # ---- glue (plain JAX, O(N) cost): centroid init + coordinate tables -------
    # adaptive_avg_pool2d with evenly divisible bins == block mean
    # TODO(synk): general adaptive_avg_pool2d bin boundaries for non-divisible H/W
    assert H % nsh == 0 and W % nsw == 0
    cen = pixel_features.astype(jnp.float32).reshape(
        B, C, nsh, H // nsh, nsw, W // nsw).mean(axis=(3, 5))
    cen_sc = jnp.transpose(cen.reshape(B, C, S), (0, 2, 1))          # (B, S, C) f32

    # nearest-neighbour upsample of the arange(S) grid (== F.interpolate 'nearest')
    row = (jnp.arange(H, dtype=jnp.int32) * nsh) // H                # token row -> spixel row
    col = (jnp.arange(W, dtype=jnp.int32) * nsw) // W                # token col -> spixel col
    lab_h = jnp.broadcast_to(row[:, None], (H, W)).reshape(N)
    lab_w = jnp.broadcast_to(col[None, :], (H, W)).reshape(N)
    tok_wh = jnp.stack([lab_w, lab_h], axis=0).astype(jnp.int32)     # (2, N)

    s_idx = jnp.arange(S, dtype=jnp.int32)
    sp_lo = (jnp.stack([s_idx % nsw, s_idx // nsw], axis=1)
             .astype(jnp.int32) - jnp.int32(r))                      # (S, 2) lower bounds

    # single bf16 (C, N) token stream + exact f32 squared norms
    px_f32 = pixel_features.reshape(B, C, N).astype(jnp.float32)
    px2 = jnp.sum(px_f32 * px_f32, axis=1, keepdims=True)            # (B, 1, N) f32
    px_cn = px_f32.astype(jnp.bfloat16)                              # (B, C, N)

    if has_pad:
        pad = n_pad - N
        px_cn = jnp.pad(px_cn, ((0, 0), (0, 0), (0, pad)))
        px2 = jnp.pad(px2, ((0, 0), (0, 0), (0, pad)))
        tok_wh = jnp.pad(tok_wh, ((0, 0), (0, pad)))

    vmem_limit = int(min(vmem_cap, max(_vmem_budget(S, C, tn), 32 << 20)))

    kernel = functools.partial(
        _cluster_kernel, n_iters=n_iters, temperature=float(temperature), r=r,
        num_spixels=S, n_valid=N, tile_n=tn, has_pad=bool(has_pad))

    n_last = n_chunks - 1

    sp_out, lbl_out = pl.pallas_call(
        kernel,
        out_shape=(jax.ShapeDtypeStruct((B, S, C), jnp.float32),
                   jax.ShapeDtypeStruct((B, 1, n_pad), jnp.int32)),
        grid_spec=pltpu.PrefetchScalarGridSpec(
            num_scalar_prefetch=0,
            grid=(B, n_iters + 1, n_chunks),
            in_specs=[
                pl.BlockSpec((1, S, C), lambda b, it, k: (b, 0, 0)),
                pl.BlockSpec((1, C, tn), lambda b, it, k: (b, 0, k)),
                pl.BlockSpec((1, 1, tn), lambda b, it, k: (b, 0, k)),
                # token coords: not needed on the final (label) sweep -> freeze
                # the index so no DMA is issued there
                pl.BlockSpec((2, tn),
                             lambda b, it, k: (0, jnp.where(it < n_iters, k, n_last))),
                pl.BlockSpec((S, 2), lambda b, it, k: (0, 0)),
            ],
            out_specs=[
                pl.BlockSpec((1, S, C), lambda b, it, k: (b, 0, 0)),
                # labels are only written on the final sweep: keep the block
                # index frozen during update sweeps so no stale block is ever
                # written back to HBM
                pl.BlockSpec((1, 1, tn),
                             lambda b, it, k: (b, 0, jnp.where(it < n_iters, 0, k))),
            ],
            scratch_shapes=[pltpu.VMEM((S, C), jnp.float32),   # centroid state (f32)
                            pltpu.VMEM((S, C), jnp.bfloat16),  # cached bf16 centroids
                            pltpu.VMEM((S, 1), jnp.float32),   # cached |sp|^2
                            pltpu.VMEM((S, C), jnp.float32),   # num accumulator
                            pltpu.VMEM((S, 1), jnp.float32)]), # den accumulator
        compiler_params=pltpu.CompilerParams(
            dimension_semantics=("parallel", "arbitrary", "arbitrary"),
            vmem_limit_bytes=vmem_limit),
        input_output_aliases={0: 0},      # cen_sc (B,S,C) f32 -> spixel feats out
    )(cen_sc, px_cn, px2, tok_wh, sp_lo)

    hard_labels = lbl_out[:, 0, :N]                                  # (B, N)
    return sp_out, hard_labels, (nsh, nsw)


def _reference(pixel_features, *, nsh, nsw, n_iters, temperature, r):
    """Pure-JAX f32 mirror of the PyTorch forward (for validation)."""
    B, C, H, W = pixel_features.shape
    S, N = nsh * nsw, H * W
    cen = pixel_features.reshape(B, C, nsh, H // nsh, nsw, W // nsw).mean(axis=(3, 5))
    sp = cen.reshape(B, C, S)                                        # (B, C, S)
    row = (jnp.arange(H) * nsh) // H
    col = (jnp.arange(W) * nsw) // W
    init_label = (row[:, None] * nsw + col[None, :]).reshape(N)
    s_idx = jnp.arange(S)
    rel_w = init_label[None, :] % nsw - (s_idx % nsw)[:, None]
    rel_h = init_label[None, :] // nsw - (s_idx // nsw)[:, None]
    mask_dist = jnp.where((jnp.abs(rel_w) <= r) & (jnp.abs(rel_h) <= r), 0.0, 1e16)
    px = pixel_features.reshape(B, C, N)
    pxT = jnp.transpose(px, (0, 2, 1))

    def pdist(sp_):
        return (jnp.sum(px * px, axis=1)[:, None, :]
                + jnp.sum(sp_ * sp_, axis=1)[:, :, None]
                - 2.0 * jnp.einsum('bcs,bcn->bsn', sp_, px))

    for _ in range(n_iters):
        d = pdist(sp) + mask_dist[None]
        aff = jax.nn.softmax(-d * temperature, axis=1)
        spf = jnp.einsum('bsn,bnc->bsc', aff, pxT)
        spf = spf / jnp.maximum(jnp.sum(aff, axis=2, keepdims=True), 1e-16)
        sp = jnp.transpose(spf, (0, 2, 1))
    labels = jnp.argmin(pdist(sp), axis=1)
    return jnp.transpose(sp, (0, 2, 1)), labels


if __name__ == "__main__":
    key1, key2 = jax.random.split(jax.random.PRNGKey(0), 2)

    # ---- test 1: divisible shapes, multiple N chunks ---------------------------
    B, C, H, W = 2, 4, 16, 16
    x = jax.random.normal(key1, (B, C, H, W), dtype=jnp.float32)
    nsh = nsw = 4

    @jax.jit
    def run1(inp):
        sp, lbl, _ = token_clustering_block(
            inp, num_spixels=nsh * nsw, n_iters=2, temperature=0.01,
            window_size=3, tile_n=128)   # tile_n=128 -> exercises 2 N-chunks
        return sp, lbl

    sp_feats, labels = run1(x)
    sp_feats = jax.block_until_ready(sp_feats)
    labels = jax.block_until_ready(labels)

    assert sp_feats.shape == (B, nsh * nsw, C)
    assert labels.shape == (B, H * W)
    assert bool(jnp.all(labels >= 0)) and bool(jnp.all(labels < nsh * nsw))
    assert bool(jnp.all(jnp.isfinite(sp_feats)))

    ref_sp, _ = _reference(x, nsh=nsh, nsw=nsw, n_iters=2, temperature=0.01, r=1)
    assert bool(jnp.allclose(sp_feats, ref_sp, rtol=5e-2, atol=5e-2))

    # ---- test 2: N not a multiple of 128 (exercises the padding path) ----------
    B2, C2, H2, W2 = 1, 4, 12, 10
    x2 = jax.random.normal(key2, (B2, C2, H2, W2), dtype=jnp.float32)
    nsh2, nsw2 = 3, 5

    @jax.jit
    def run2(inp):
        sp, lbl, _ = token_clustering_block(
            inp, num_spixels=(nsh2, nsw2), n_iters=2, temperature=0.01,
            window_size=3)               # default tile path + get_tpu_info
        return sp, lbl

    sp_feats2, labels2 = run2(x2)
    sp_feats2 = jax.block_until_ready(sp_feats2)
    labels2 = jax.block_until_ready(labels2)

    assert sp_feats2.shape == (B2, nsh2 * nsw2, C2)
    assert labels2.shape == (B2, H2 * W2)
    assert bool(jnp.all(labels2 >= 0)) and bool(jnp.all(labels2 < nsh2 * nsw2))
    assert bool(jnp.all(jnp.isfinite(sp_feats2)))

    ref_sp2, _ = _reference(x2, nsh=nsh2, nsw=nsw2, n_iters=2,
                            temperature=0.01, r=1)
    assert bool(jnp.allclose(sp_feats2, ref_sp2, rtol=5e-2, atol=5e-2))

    print("KERNEL_OK")
</pallas_src>

<mosaic_0001>
module attributes {stable_mosaic.version = 11 : i64} {
  func.func @_cluster_kernel(%arg0: i32, %arg1: i32, %arg2: i32, %arg3: memref<1x16x4xf32, #tpu.memory_space<vmem>>, %arg4: memref<1x4x128xbf16, #tpu.memory_space<vmem>>, %arg5: memref<1x1x128xf32, #tpu.memory_space<vmem>>, %arg6: memref<2x128xi32, #tpu.memory_space<vmem>>, %arg7: memref<16x2xi32, #tpu.memory_space<vmem>>, %arg8: memref<1x16x4xf32, #tpu.memory_space<vmem>>, %arg9: memref<1x1x128xi32, #tpu.memory_space<vmem>>, %arg10: memref<16x4xf32, #tpu.memory_space<vmem>>, %arg11: memref<16x4xbf16, #tpu.memory_space<vmem>>, %arg12: memref<16x1xf32, #tpu.memory_space<vmem>>, %arg13: memref<16x4xf32, #tpu.memory_space<vmem>>, %arg14: memref<16x1xf32, #tpu.memory_space<vmem>>) attributes {dimension_semantics = [#tpu.dimension_semantics<parallel>, #tpu.dimension_semantics<arbitrary>, #tpu.dimension_semantics<arbitrary>], iteration_bounds = array<i64: 2, 3, 2>, scalar_prefetch = 0 : i64, scratch_operands = 5 : i64, tpu.core_type = #tpu.core_type<tc>, window_params = [{transform_indices = @transform_0, window_bounds = array<i64: 1, 16, 4>}, {transform_indices = @transform_1, window_bounds = array<i64: 1, 4, 128>}, {transform_indices = @transform_2, window_bounds = array<i64: 1, 1, 128>}, {transform_indices = @transform_3, window_bounds = array<i64: 2, 128>}, {pipeline_mode = #tpu.pipeline_mode<synchronous>, transform_indices = @transform_4, window_bounds = array<i64: 16, 2>}, {transform_indices = @transform_5, window_bounds = array<i64: 1, 16, 4>}, {transform_indices = @transform_6, window_bounds = array<i64: 1, 1, 128>}]} {
    %c0_i32 = arith.constant 0 : i32
    %0 = arith.cmpi eq, %arg1, %c0_i32 : i32
    %c0_i32_0 = arith.constant 0 : i32
    %1 = arith.cmpi eq, %arg2, %c0_i32_0 : i32
    %2 = arith.andi %0, %1 : i1
    %3 = arith.extui %2 : i1 to i32
    %c0_i32_1 = arith.constant 0 : i32
    %4 = arith.cmpi ne, %3, %c0_i32_1 : i32
    scf.if %4 {
      %c0_18 = arith.constant 0 : index
      %c0_19 = arith.constant 0 : index
      %c0_20 = arith.constant 0 : index
      %29 = vector.load %arg3[%c0_18, %c0_19, %c0_20] : memref<1x16x4xf32, #tpu.memory_space<vmem>>, vector<1x16x4xf32>
      %30 = vector.shape_cast %29 : vector<1x16x4xf32> to vector<16x4xf32>
      %c0_21 = arith.constant 0 : index
      %c0_22 = arith.constant 0 : index
      %31 = vector.load %arg10[%c0_21, %c0_22] : memref<16x4xf32, #tpu.memory_space<vmem>>, vector<16x4xf32>
      tpu.vector_store %arg10[%c0_21, %c0_22], %30 {strides = array<i32>} : memref<16x4xf32, #tpu.memory_space<vmem>>, vector<16x4xf32>,
      %32 = arith.truncf %30 : vector<16x4xf32> to vector<16x4xbf16>
      %c0_23 = arith.constant 0 : index
      %c0_24 = arith.constant 0 : index
      %33 = vector.load %arg11[%c0_23, %c0_24] : memref<16x4xbf16, #tpu.memory_space<vmem>>, vector<16x4xbf16>
      tpu.vector_store %arg11[%c0_23, %c0_24], %32 {strides = array<i32>} : memref<16x4xbf16, #tpu.memory_space<vmem>>, vector<16x4xbf16>,
      %34 = arith.mulf %30, %30 : vector<16x4xf32>
      %cst_25 = arith.constant dense<0.000000e+00> : vector<16xf32>
      %35 = vector.multi_reduction <add>, %34, %cst_25 [1] : vector<16x4xf32> to vector<16xf32>
      %36 = vector.shape_cast %35 : vector<16xf32> to vector<16x1xf32>
      %c0_26 = arith.constant 0 : index
      %c0_27 = arith.constant 0 : index
      %37 = vector.load %arg12[%c0_26, %c0_27] : memref<16x1xf32, #tpu.memory_space<vmem>>, vector<16x1xf32>
      tpu.vector_store %arg12[%c0_26, %c0_27], %36 {strides = array<i32>} : memref<16x1xf32, #tpu.memory_space<vmem>>, vector<16x1xf32>,
    } else {
    }
    %c2_i32 = arith.constant 2 : i32
    %5 = arith.cmpi slt, %arg1, %c2_i32 : i32
    %c0_i32_2 = arith.constant 0 : i32
    %6 = arith.cmpi eq, %arg2, %c0_i32_2 : i32
    %7 = arith.andi %5, %6 : i1
    %8 = arith.extui %7 : i1 to i32
    %c0_i32_3 = arith.constant 0 : i32
    %9 = arith.cmpi ne, %8, %c0_i32_3 : i32
    scf.if %9 {
      %cst_18 = arith.constant 0.000000e+00 : f32
      %29 = vector.broadcast %cst_18 : f32 to vector<16x4xf32>
      %c0_19 = arith.constant 0 : index
      %c0_20 = arith.constant 0 : index
      %30 = vector.load %arg13[%c0_19, %c0_20] : memref<16x4xf32, #tpu.memory_space<vmem>>, vector<16x4xf32>
      tpu.vector_store %arg13[%c0_19, %c0_20], %29 {strides = array<i32>} : memref<16x4xf32, #tpu.memory_space<vmem>>, vector<16x4xf32>,
      %cst_21 = arith.constant 0.000000e+00 : f32
      %31 = vector.broadcast %cst_21 : f32 to vector<16x1xf32>
      %c0_22 = arith.constant 0 : index
      %c0_23 = arith.constant 0 : index
      %32 = vector.load %arg14[%c0_22, %c0_23] : memref<16x1xf32, #tpu.memory_space<vmem>>, vector<16x1xf32>
      tpu.vector_store %arg14[%c0_22, %c0_23], %31 {strides = array<i32>} : memref<16x1xf32, #tpu.memory_space<vmem>>, vector<16x1xf32>,
    } else {
    }
    %c0 = arith.constant 0 : index
    %c0_4 = arith.constant 0 : index
    %c0_5 = arith.constant 0 : index
    %10 = vector.load %arg4[%c0, %c0_4, %c0_5] : memref<1x4x128xbf16, #tpu.memory_space<vmem>>, vector<1x4x128xbf16>
    %11 = vector.shape_cast %10 : vector<1x4x128xbf16> to vector<4x128xbf16>
    %c0_6 = arith.constant 0 : index
    %c0_7 = arith.constant 0 : index
    %c0_8 = arith.constant 0 : index
    %12 = vector.load %arg5[%c0_6, %c0_7, %c0_8] : memref<1x1x128xf32, #tpu.memory_space<vmem>>, vector<1x1x128xf32>
    %13 = vector.shape_cast %12 : vector<1x1x128xf32> to vector<1x128xf32>
    %c0_9 = arith.constant 0 : index
    %c0_10 = arith.constant 0 : index
    %14 = vector.load %arg11[%c0_9, %c0_10] : memref<16x4xbf16, #tpu.memory_space<vmem>>, vector<16x4xbf16>
    %cst = arith.constant dense<0.000000e+00> : vector<16x128xf32>
    %15 = tpu.matmul %14, %11, %cst {dimension_numbers = #tpu.dot_dimension_numbers<[1], [0], [0], [1], [0, 0, 1, 1], [], []>} : vector<16x4xbf16>, vector<4x128xbf16>, vector<16x128xf32> -> vector<16x128xf32>
    %c0_11 = arith.constant 0 : index
    %c0_12 = arith.constant 0 : index
    %16 = vector.load %arg12[%c0_11, %c0_12] : memref<16x1xf32, #tpu.memory_space<vmem>>, vector<16x1xf32>
    %17 = vector.broadcast %13 : vector<1x128xf32> to vector<16x128xf32>
    %18 = vector.broadcast %16 : vector<16x1xf32> to vector<16x128xf32>
    %19 = arith.addf %17, %18 : vector<16x128xf32>
    %cst_13 = arith.constant 2.000000e+00 : f32
    %20 = vector.broadcast %cst_13 : f32 to vector<16x128xf32>
    %21 = arith.mulf %20, %15 : vector<16x128xf32>
    %22 = arith.subf %19, %21 : vector<16x128xf32>
    %c2_i32_14 = arith.constant 2 : i32
    %23 = arith.cmpi slt, %arg1, %c2_i32_14 : i32
    %24 = arith.extui %23 : i1 to i32
    %c0_i32_15 = arith.constant 0 : i32
    %25 = arith.cmpi ne, %24, %c0_i32_15 : i32
    scf.if %25 {
      %c0_18 = arith.constant 0 : index
      %c0_19 = arith.constant 0 : index
      %29 = vector.load %arg6[%c0_18, %c0_19] : memref<2x128xi32, #tpu.memory_space<vmem>>, vector<2x128xi32>
      %c0_20 = arith.constant 0 : index
      %c0_21 = arith.constant 0 : index
      %30 = vector.load %arg7[%c0_20, %c0_21] : memref<16x2xi32, #tpu.memory_space<vmem>>, vector<16x2xi32>
      %31 = vector.extract_strided_slice %29 {offsets = [0, 0], sizes = [1, 128], strides = [1, 1]} : vector<2x128xi32> to vector<1x128xi32>
      %32 = vector.extract_strided_slice %30 {offsets = [0, 0], sizes = [16, 1], strides = [1, 1]} : vector<16x2xi32> to vector<16x1xi32>
      %33 = vector.broadcast %31 : vector<1x128xi32> to vector<16x128xi32>
      %34 = vector.broadcast %32 : vector<16x1xi32> to vector<16x128xi32>
      %35 = arith.subi %33, %34 : vector<16x128xi32>
      %36 = tpu.bitcast %35 : vector<16x128xi32> -> vector<16x128xi32>
      %37 = vector.extract_strided_slice %29 {offsets = [1, 0], sizes = [1, 128], strides = [1, 1]} : vector<2x128xi32> to vector<1x128xi32>
      %38 = vector.extract_strided_slice %30 {offsets = [0, 1], sizes = [16, 1], strides = [1, 1]} : vector<16x2xi32> to vector<16x1xi32>
      %39 = vector.broadcast %37 : vector<1x128xi32> to vector<16x128xi32>
      %40 = vector.broadcast %38 : vector<16x1xi32> to vector<16x128xi32>
      %41 = arith.subi %39, %40 : vector<16x128xi32>
      %42 = tpu.bitcast %41 : vector<16x128xi32> -> vector<16x128xi32>
      %c2_i32_22 = arith.constant 2 : i32
      %43 = vector.broadcast %c2_i32_22 : i32 to vector<16x128xi32>
      %44 = arith.cmpi ule, %36, %43 : vector<16x128xi32>
      %c2_i32_23 = arith.constant 2 : i32
      %45 = vector.broadcast %c2_i32_23 : i32 to vector<16x128xi32>
      %46 = arith.cmpi ule, %42, %45 : vector<16x128xi32>
      %47 = arith.andi %44, %46 : vector<16x128xi1>
      %cst_24 = arith.constant -0.00999999977 : f32
      %48 = vector.broadcast %cst_24 : f32 to vector<16x128xf32>
      %49 = arith.mulf %22, %48 : vector<16x128xf32>
      %cst_25 = arith.constant -1.000000e+30 : f32
      %50 = vector.broadcast %cst_25 : f32 to vector<16x128xf32>
      %51 = arith.select %47, %49, %50 : vector<16x128xi1>, vector<16x128xf32>
      %cst_26 = arith.constant dense<0xFF800000> : vector<128xf32>
      %52 = vector.multi_reduction <maximumf>, %51, %cst_26 [0] : vector<16x128xf32> to vector<128xf32>
      %53 = vector.shape_cast %52 : vector<128xf32> to vector<1x128xf32>
      %54 = vector.broadcast %53 : vector<1x128xf32> to vector<16x128xf32>
      %55 = arith.subf %51, %54 : vector<16x128xf32>
      %56 = math.exp %55 : vector<16x128xf32>
      %cst_27 = arith.constant dense<0.000000e+00> : vector<128xf32>
      %57 = vector.multi_reduction <add>, %56, %cst_27 [0] : vector<16x128xf32> to vector<128xf32>
      %58 = vector.shape_cast %57 : vector<128xf32> to vector<1x128xf32>
      %59 = tpu.reciprocal %58 {approx = true} : vector<1x128xf32> -> vector<1x128xf32>
      %60 = vector.broadcast %59 : vector<1x128xf32> to vector<16x128xf32>
      %61 = arith.mulf %56, %60 : vector<16x128xf32>
      %c0_28 = arith.constant 0 : index
      %c0_29 = arith.constant 0 : index
      %62 = vector.load %arg13[%c0_28, %c0_29] : memref<16x4xf32, #tpu.memory_space<vmem>>, vector<16x4xf32>
      %63 = arith.truncf %61 : vector<16x128xf32> to vector<16x128xbf16>
      %cst_30 = arith.constant dense<0.000000e+00> : vector<16x4xf32>
      %64 = tpu.matmul %63, %11, %cst_30 {dimension_numbers = #tpu.dot_dimension_numbers<[1], [1], [0], [0], [0, 0, 1, 0], [], []>} : vector<16x128xbf16>, vector<4x128xbf16>, vector<16x4xf32> -> vector<16x4xf32>
      %65 = arith.addf %62, %64 : vector<16x4xf32>
      %c0_31 = arith.constant 0 : index
      %c0_32 = arith.constant 0 : index
      %66 = vector.load %arg13[%c0_31, %c0_32] : memref<16x4xf32, #tpu.memory_space<vmem>>, vector<16x4xf32>
      tpu.vector_store %arg13[%c0_31, %c0_32], %65 {strides = array<i32>} : memref<16x4xf32, #tpu.memory_space<vmem>>, vector<16x4xf32>,
      %c0_33 = arith.constant 0 : index
      %c0_34 = arith.constant 0 : index
      %67 = vector.load %arg14[%c0_33, %c0_34] : memref<16x1xf32, #tpu.memory_space<vmem>>, vector<16x1xf32>
      %cst_35 = arith.constant dense<0.000000e+00> : vector<16xf32>
      %68 = vector.multi_reduction <add>, %61, %cst_35 [1] : vector<16x128xf32> to vector<16xf32>
      %69 = vector.shape_cast %68 : vector<16xf32> to vector<16x1xf32>
      %70 = arith.addf %67, %69 : vector<16x1xf32>
      %c0_36 = arith.constant 0 : index
      %c0_37 = arith.constant 0 : index
      %71 = vector.load %arg14[%c0_36, %c0_37] : memref<16x1xf32, #tpu.memory_space<vmem>>, vector<16x1xf32>
      tpu.vector_store %arg14[%c0_36, %c0_37], %70 {strides = array<i32>} : memref<16x1xf32, #tpu.memory_space<vmem>>, vector<16x1xf32>,
      %c1_i32 = arith.constant 1 : i32
      %72 = arith.cmpi eq, %arg2, %c1_i32 : i32
      %73 = arith.extui %72 : i1 to i32
      %c0_i32_38 = arith.constant 0 : i32
      %74 = arith.cmpi ne, %73, %c0_i32_38 : i32
      scf.if %74 {
        %c0_39 = arith.constant 0 : index
        %c0_40 = arith.constant 0 : index
        %75 = vector.load %arg13[%c0_39, %c0_40] : memref<16x4xf32, #tpu.memory_space<vmem>>, vector<16x4xf32>
        %c0_41 = arith.constant 0 : index
        %c0_42 = arith.constant 0 : index
        %76 = vector.load %arg14[%c0_41, %c0_42] : memref<16x1xf32, #tpu.memory_space<vmem>>, vector<16x1xf32>
        %cst_43 = arith.constant 1.000000e-16 : f32
        %77 = vector.broadcast %cst_43 : f32 to vector<16x1xf32>
        %78 = arith.maximumf %76, %77 : vector<16x1xf32>
        %79 = vector.broadcast %78 : vector<16x1xf32> to vector<16x4xf32>
        %80 = arith.divf %75, %79 : vector<16x4xf32>
        %c0_44 = arith.constant 0 : index
        %c0_45 = arith.constant 0 : index
        %81 = vector.load %arg10[%c0_44, %c0_45] : memref<16x4xf32, #tpu.memory_space<vmem>>, vector<16x4xf32>
        tpu.vector_store %arg10[%c0_44, %c0_45], %80 {strides = array<i32>} : memref<16x4xf32, #tpu.memory_space<vmem>>, vector<16x4xf32>,
        %82 = arith.truncf %80 : vector<16x4xf32> to vector<16x4xbf16>
        %c0_46 = arith.constant 0 : index
        %c0_47 = arith.constant 0 : index
        %83 = vector.load %arg11[%c0_46, %c0_47] : memref<16x4xbf16, #tpu.memory_space<vmem>>, vector<16x4xbf16>
        tpu.vector_store %arg11[%c0_46, %c0_47], %82 {strides = array<i32>} : memref<16x4xbf16, #tpu.memory_space<vmem>>, vector<16x4xbf16>,
        %84 = arith.mulf %80, %80 : vector<16x4xf32>
        %cst_48 = arith.constant dense<0.000000e+00> : vector<16xf32>
        %85 = vector.multi_reduction <add>, %84, %cst_48 [1] : vector<16x4xf32> to vector<16xf32>
        %86 = vector.shape_cast %85 : vector<16xf32> to vector<16x1xf32>
        %c0_49 = arith.constant 0 : index
        %c0_50 = arith.constant 0 : index
        %87 = vector.load %arg12[%c0_49, %c0_50] : memref<16x1xf32, #tpu.memory_space<vmem>>, vector<16x1xf32>
        tpu.vector_store %arg12[%c0_49, %c0_50], %86 {strides = array<i32>} : memref<16x1xf32, #tpu.memory_space<vmem>>, vector<16x1xf32>,
      } else {
      }
    } else {
    }
    %c2_i32_16 = arith.constant 2 : i32
    %26 = arith.cmpi eq, %arg1, %c2_i32_16 : i32
    %27 = arith.extui %26 : i1 to i32
    %c0_i32_17 = arith.constant 0 : i32
    %28 = arith.cmpi ne, %27, %c0_i32_17 : i32
    scf.if %28 {
      %cst_18 = arith.constant dense<0x7F800000> : vector<128xf32>
      %29 = vector.multi_reduction <minimumf>, %22, %cst_18 [0] : vector<16x128xf32> to vector<128xf32>
      %30 = vector.shape_cast %29 : vector<128xf32> to vector<1x128xf32>
      %31 = tpu.iota {dimensions = array<i32: 0>} : vector<16x128xi32>
      %32 = vector.broadcast %30 : vector<1x128xf32> to vector<16x128xf32>
      %33 = arith.cmpf oeq, %22, %32 : vector<16x128xf32>
      %c16_i32 = arith.constant 16 : i32
      %34 = vector.broadcast %c16_i32 : i32 to vector<16x128xi32>
      %35 = arith.select %33, %31, %34 : vector<16x128xi1>, vector<16x128xi32>
      %cst_19 = arith.constant dense<2147483647> : vector<128xi32>
      %36 = vector.multi_reduction <minsi>, %35, %cst_19 [0] : vector<16x128xi32> to vector<128xi32>
      %37 = vector.shape_cast %36 : vector<128xi32> to vector<1x128xi32>
      %c0_20 = arith.constant 0 : index
      %c0_21 = arith.constant 0 : index
      %c0_22 = arith.constant 0 : index
      %38 = vector.load %arg9[%c0_20, %c0_21, %c0_22] : memref<1x1x128xi32, #tpu.memory_space<vmem>>, vector<1x1x128xi32>
      %39 = vector.shape_cast %38 : vector<1x1x128xi32> to vector<1x128xi32>
      %40 = vector.shape_cast %37 : vector<1x128xi32> to vector<1x1x128xi32>
      tpu.vector_store %arg9[%c0_20, %c0_21, %c0_22], %40 {strides = array<i32>} : memref<1x1x128xi32, #tpu.memory_space<vmem>>, vector<1x1x128xi32>,
      %c1_i32 = arith.constant 1 : i32
      %41 = arith.cmpi eq, %arg2, %c1_i32 : i32
      %42 = arith.extui %41 : i1 to i32
      %c0_i32_23 = arith.constant 0 : i32
      %43 = arith.cmpi ne, %42, %c0_i32_23 : i32
      scf.if %43 {
        %c0_24 = arith.constant 0 : index
        %c0_25 = arith.constant 0 : index
        %44 = vector.load %arg10[%c0_24, %c0_25] : memref<16x4xf32, #tpu.memory_space<vmem>>, vector<16x4xf32>
        %c0_26 = arith.constant 0 : index
        %c0_27 = arith.constant 0 : index
        %c0_28 = arith.constant 0 : index
        %45 = vector.load %arg8[%c0_26, %c0_27, %c0_28] : memref<1x16x4xf32, #tpu.memory_space<vmem>>, vector<1x16x4xf32>
        %46 = vector.shape_cast %45 : vector<1x16x4xf32> to vector<16x4xf32>
        %47 = vector.shape_cast %44 : vector<16x4xf32> to vector<1x16x4xf32>
        tpu.vector_store %arg8[%c0_26, %c0_27, %c0_28], %47 {strides = array<i32>} : memref<1x16x4xf32, #tpu.memory_space<vmem>>, vector<1x16x4xf32>,
      } else {
      }
    } else {
    }
    return
  }
  func.func @transform_0(%arg0: i32, %arg1: i32, %arg2: i32) -> (i32, i32, i32) {
    %c0_i32 = arith.constant 0 : i32
    %c0_i32_0 = arith.constant 0 : i32
    %c0_i32_1 = arith.constant 0 : i32
    return %arg0, %c0_i32, %c0_i32_0 : i32, i32, i32
  }
  func.func @transform_1(%arg0: i32, %arg1: i32, %arg2: i32) -> (i32, i32, i32) {
    %c0_i32 = arith.constant 0 : i32
    %c0_i32_0 = arith.constant 0 : i32
    return %arg0, %c0_i32, %arg2 : i32, i32, i32
  }
  func.func @transform_2(%arg0: i32, %arg1: i32, %arg2: i32) -> (i32, i32, i32) {
    %c0_i32 = arith.constant 0 : i32
    %c0_i32_0 = arith.constant 0 : i32
    return %arg0, %c0_i32, %arg2 : i32, i32, i32
  }
  func.func @transform_3(%arg0: i32, %arg1: i32, %arg2: i32) -> (i32, i32) {
    %c2_i32 = arith.constant 2 : i32
    %0 = arith.cmpi slt, %arg1, %c2_i32 : i32
    %c1_i32 = arith.constant 1 : i32
    %1 = arith.select %0, %arg2, %c1_i32 : i32
    %c0_i32 = arith.constant 0 : i32
    %c0_i32_0 = arith.constant 0 : i32
    return %c0_i32, %1 : i32, i32
  }
  func.func @transform_4(%arg0: i32, %arg1: i32, %arg2: i32) -> (i32, i32) {
    %c0_i32 = arith.constant 0 : i32
    %c0_i32_0 = arith.constant 0 : i32
    %c0_i32_1 = arith.constant 0 : i32
    return %c0_i32, %c0_i32_0 : i32, i32
  }
  func.func @transform_5(%arg0: i32, %arg1: i32, %arg2: i32) -> (i32, i32, i32) {
    %c0_i32 = arith.constant 0 : i32
    %c0_i32_0 = arith.constant 0 : i32
    %c0_i32_1 = arith.constant 0 : i32
    return %arg0, %c0_i32, %c0_i32_0 : i32, i32, i32
  }
  func.func @transform_6(%arg0: i32, %arg1: i32, %arg2: i32) -> (i32, i32, i32) {
    %c2_i32 = arith.constant 2 : i32
    %0 = arith.cmpi slt, %arg1, %c2_i32 : i32
    %c0_i32 = arith.constant 0 : i32
    %1 = arith.select %0, %c0_i32, %arg2 : i32
    %c0_i32_0 = arith.constant 0 : i32
    %c0_i32_1 = arith.constant 0 : i32
    return %arg0, %c0_i32_0, %1 : i32, i32, i32
  }
}

</mosaic_0001>

<bundles_post_ra>
// kernel: run1.1
= control target key start
LH: loop header
LB: loop body
LE: loop exit
PB: predicated region body
PF: predicated region fallthrough
CT: control target
= control target key end

     0   :  { %s1053_s21 = smov 0   ;;  %s1055_s22 = smov 0   ;;  %s1219_s0 = inlined_call_operand.vmem [shape: f32[2,16,4], index: 0, kind: input, shape index: {}, may-alias: {0,5}]   ;;  %s1220_s1 = inlined_call_operand.vmem [shape: bf16[2,4,256], index: 1, kind: input, shape index: {}]   ;;  %s1221_s2 = inlined_call_operand.vmem [shape: f32[2,1,256], index: 2, kind: input, shape index: {}]   ;;  %s1222_s3 = inlined_call_operand.vmem [shape: s32[2,256], index: 3, kind: input, shape index: {}]   ;;  %s1223_s4 = inlined_call_operand.vmem [shape: s32[16,2], index: 4, kind: input, shape index: {}]   ;;  %s1224_s5 = inlined_call_operand.vmem [shape: f32[2,16,4], index: 5, kind: output, shape index: {0}, may-alias: {0,5}]   ;;  %s1225_s6 = inlined_call_operand.vmem [shape: s32[2,1,256], index: 6, kind: output, shape index: {1}]  }
   0x1   :  { %s1057_s23 = smov 0   ;;  %s1059_s24 = smov 0  }
   0x2   :  { %s1061_s25 = smov 0   ;;  %s1063_s26 = smov 0  }
   0x3   :  { %s1065_s27 = smov 0  }
   0x4 LB: > { %s29_s28 = sadd.s32 1, %s999_s24  ;;  %s32_s29 = sadd.s32 1, %s1003_s25  ;;  %s1011_s27 = sphi %s1065_s27, %s17_s27   ;;  %s1007_s26 = sphi %s1063_s26, %s1235_s26   ;;  %s1003_s25 = sphi %s1061_s25, %s1234_s25   ;;  %s999_s24 = sphi %s1059_s24, %s1233_s24   ;;  %s995_s23 = sphi %s1057_s23, %s1232_s23   ;;  %s991_s22 = sphi %s1055_s22, %s1231_s22   ;;  %s987_s21 = sphi %s1053_s21, %s1230_s21  }
   0x5   : > { %p30_p0 = scmp.ge.s32.totalorder %s29_s28, 2  ;;  %p852_p1 = scmp.ge.s32.totalorder %s1011_s27, 1 }
   0x6   : > { %p286_p2 = scmp.lt.s32.totalorder %s1011_s27, 13  ;;  %s36_s30 = sadd.s32 1, %s1007_s26 }
   0x7   : > { %s1237_s28 = smov (%p30_p0, %s29_s28), 0  ;;  %s1239_s29 = smov (!%p30_p0, %s32_s29), %s1003_s25 }
   0x8   : > { %p287_p3 = pnand %p852_p1, %p286_p2  ;;  %p34_p4 = scmp.ge.s32.totalorder %s1239_s29, 3 }
   0x9   : > { %p346_p6 = scmp.lt.s32.totalorder (!%p287_p3), %s995_s23, 1  ;;  %p353_p7 = scmp.lt.s32.totalorder (!%p287_p3), %s987_s21, 1 }
   0xa   : > { %s1241_s29 = smov (%p34_p4, %s1239_s29), 0  ;;  %s1243_s30 = smov (!%p34_p4, %s36_s30), %s1007_s26 }
   0xb   : > { %1226 = sst [smem:[#allocation7_spill]] %s1241_s29  ;;  %p38_p5 = scmp.ge.s32.totalorder %s1243_s30, 2 }
   0xc   : > { %290 = sbr.rel (%p287_p3) target bundleno = 940 (0x3ac), region = 40  ;;  %p366_p8 = scmp.lt.s32.totalorder (!%p287_p3), %s991_s22, 2 }
   0xd   : > { %s1245_s30 = smov (%p38_p5, %s1243_s30), 0  ;;  %p391_p9 = scmp.eq.s32.totalorder (!%p287_p3), %s991_s22, 0 }
   0xe   : > { %1227 = sst [smem:[#allocation8_spill]] %s1245_s30  ;;  %p392_p11 = scmp.eq.s32.totalorder (!%p287_p3), %s987_s21, 0 }
  0x10   : > { %p393_p13 = pnand (!%p287_p3), %p392_p11, %p391_p9 }
  0x11   : > { %s1247_s23 = smov (!%p346_p6, %s995_s23), 1 }
  0x12   : > { %s354_s7 = scalar_select %p353_p7, %s987_s21, 1 }
  0x13   : > { %s877_s8 = sshll.u32 %s1247_s23, 4  ;;  %s855_s9 = sshll.u32 %s1247_s23, 1 }
  0x14   : > { %s350_s12 = scalar_lea.vmem %s1219_s0, %s877_s8  ;;  %s1106_s13 = sadd.s32 %s855_s9, %s354_s7 }
  0x15   : > { %s856_s14 = sshll.u32 %s1106_s13, 1  ;;  %s365_s17 = scalar_lea.vmem %s1221_s2, %s1106_s13 }
  0x16   : > { %s1116_s20 = scalar_lea.vmem %s1220_s1, %s856_s14  ;;  %s1121_s29 = scalar_lea.vmem %s1224_s5, %s877_s8 }
  0x17   : > { %s367_s7 = scalar_select %p366_p8, %s987_s21, 1 }
  0x18   : > { %s380_s10 = scalar_select %p366_p8, 0, %s987_s21 }
  0x19   : > { %p368_p10 = scmp.lt.s32.totalorder %s367_s7, 1 }
  0x1a   : > { %p383_p12 = scmp.lt.s32.totalorder %s380_s10, 1  ;;  %396 = sbr.rel (%p393_p13) target bundleno = 160 (0xa0), region = 44 }
  0x1b   : > { %s1249_s7 = smov (!%p368_p10, %s367_s7), 1 }
  0x1c   : > { %s1251_s10 = smov (!%p383_p12, %s380_s10), 1  ;;  %s858_s11 = sshll.u32 %s1249_s7, 1 }
  0x1d   : > { %s1137_s16 = scalar_lea.vmem %s1222_s3, %s858_s11  ;;  %s1139_s30 = sadd.s32 %s855_s9, %s1251_s10 }
  0x1e   : > { %s387_s19 = scalar_lea.vmem %s1225_s6, %s1139_s30 }
  0x1f   : > { %v397_v0 = vld [vmem:[%s350_s12] sm:$0xff]  ;;  %vm399_vm0 = vcmask 31744   ;;  %vm404_vm1 = vcmask 27648   ;;  %v398_v1 = vld [vmem:[%s350_s12 + $0x8] sm:$0xff]  ;;  %vm415_vm2 = vcmask 7168  }
  0x20   : > { %v407_v2 = vmul.f32 %v397_v0, %v397_v0  ;;  %400 = vst.msk [vmem:[#allocation2] sm:$0xff] %vm399_vm0, %v397_v0  ;;  %v402_v3 = vpack.c.bf16 %v397_v0, %v397_v0  ;;  %v403_v4 = vpack.c.bf16 %v398_v1, %v398_v1  ;;  %v408_v6 = vmul.f32 %v398_v1, %v398_v1 }
  0x21   : > { %401 = vst.msk [vmem:[#allocation2 + $0x8] sm:$0xff] %vm399_vm0, %v398_v1 }
  0x22   : > { %v409_v5 = vsel %vm399_vm0, %v407_v2, 0.0  ;;  %405 = vst.msk [vmem:[#allocation3] sm:$0xf] %vm404_vm1, %v402_v3  ;;  %v412_v7 = vsel %vm399_vm0, %v408_v6, 0.0 }
  0x23   : > { %410 = vadd.xlane.f32.xlu0 %v409_v5  ;;  %406 = vst.msk [vmem:[#allocation3 + $0x4] sm:$0xf] %vm404_vm1, %v403_v4 }
  0x2b   : > { %413 = vadd.xlane.f32.xlu0 %v412_v7 }
  0x96   : > { %v411_v8 = vpop.xlane.xlu0 %410 }
  0x97   : > { %416 = vst.msk [vmem:[#allocation4] sm:$0xff] %vm415_vm2, %v411_v8 }
  0x9e   : > { %v414_v9 = vpop.xlane.xlu0 %413 }
  0x9f   : > { %417 = vst.msk [vmem:[#allocation4 + $0x8] sm:$0xff] %vm415_vm2, %v414_v9 }
  0xa0 PF: > { %p419_p0 = pnand %p392_p11, %p366_p8 }
  0xa2   : > { %422 = sbr.rel (%p419_p0) target bundleno = 172 (0xac), region = 48 }
  0xa7   : > { %vm423_vm3 = vcmask 31744   ;;  %vm426_vm4 = vcmask 7168   ;;  %v1013_v10 = vmov 0.0  }
  0xa8   : > { %424 = vst.msk [vmem:[#allocation5] sm:$0xff] %vm423_vm3, %v1013_v10 }
  0xa9   : > { %425 = vst.msk [vmem:[#allocation5 + $0x8] sm:$0xff] %vm423_vm3, %v1013_v10 }
  0xaa   : > { %427 = vst.msk [vmem:[#allocation6] sm:$0xff] %vm426_vm4, %v1013_v10 }
  0xab   : > { %428 = vst.msk [vmem:[#allocation6 + $0x8] sm:$0xff] %vm426_vm4, %v1013_v10 }
  0xac PF: > { %v429_v11 = vld [vmem:[%s1116_s20] sm:$0x3]  ;;  %vm442_vm5 = vcmask 1041408   ;;  %v879_v13 = vld [vmem:[#allocation3] sm:$0xff]  ;;  %v1014_v14 = vmov 0   ;;  %v460_v15 = vld [vmem:[#allocation4] sm:$0xff] }
  0xad   : > { %v444_v12 = vsel %vm442_vm5, %v429_v11, 0  ;;  %941 = vset.pattern.permute.xlu0 %v1014_v14  ;;  %vm438_vm6 = vcmask 31744   ;;  %v461_v16 = vld [vmem:[#allocation4 + $0x8] sm:$0xff]  ;;  %p867_p1 = scmp.ge.s32.totalorder %s991_s22, 2 }
  0xae   : > { %453 = vmatpush.bf16.msra.mxu0 %v444_v12  ;;  %467 = vperm.xlu0 %941, %v460_v15   ;;  %v942_v17 = vld [vmem:[%s365_s17] ss:$0 sm:$0xff]  ;;  %p872_p2 = scmp.ne.s32.totalorder (!%p867_p1), %s987_s21, 1 }
  0xb1   : > { %866 = vmatmul.msk.bf16.vlgmr.msra.gmra.mxu0 %vm438_vm6, %v879_v13 }
  0xb6   : > { %472 = vperm.xlu0 %941, %v461_v16  }
 0x120   : > { %v468_v18 = vpop.permute.xlu0 %467 }
 0x121   : > { %v475_v19 = vadd.f32 %v942_v17, %v468_v18 }
 0x128   : > { %v473_v23 = vpop.permute.xlu0 %472 }
 0x129   : > { %v476_v25 = vadd.f32 %v942_v17, %v473_v23 }
 0x12e   : > { %v455_v20 = vpop.f32.mrf.mxu0 }
 0x12f   : > { %v477_v21 = vmul.f32 2.0, %v455_v20 }
 0x131   : > { %v1156_v22 = vsub.f32 %v475_v19, %v477_v21 }
 0x135   : > { %483 = sbr.rel (%p867_p1) target bundleno = 899 (0x383), region = 52 }
 0x136   : > { %v457_v24 = vpop.f32.mrf.mxu0 }
 0x137   : > { %v478_v26 = vmul.f32 2.0, %v457_v24 }
 0x139   : > { %v1158_v27 = vsub.f32 %v476_v25, %v478_v26 }
 0x13a   : > { %v485_v28 = vld [vmem:[%s1223_s4] sm:$0xff]  ;;  %556 = vmatpush.bf16.xpose.msra.mxu0 %v429_v11  ;;  %v1015_v29 = vmov 1   ;;  %v1016_v30 = vmov 0   ;;  %v486_v31 = vld [vmem:[%s1223_s4 + $0x8] sm:$0xff]  ;;  %v519_v45 = vmul.f32 -0.01, %v1156_v22 }
 0x13b   : > { %944 = vset.pattern.permute.xlu1 %v1015_v29  ;;  %943 = vset.pattern.permute.xlu0 %v1016_v30  ;;  %v484_v32 = vld [vmem:[%s1137_s16] sm:$0x3]  ;;  %v520_v47 = vmul.f32 -0.01, %v1158_v27  ;;  %v567_v11 = vld [vmem:[#allocation6] sm:$0xff]  ;;  %vm575_vm13 = vcmask 7168  }
 0x13c   : > { %498 = vperm.xlu1 %944, %v485_v28   ;;  %489 = vperm.xlu0 %943, %v485_v28   ;;  %v496_v33 = vperm.slane %v484_v32, 1  ;;  %v487_v34 = vperm.slane %v484_v32, 0  ;;  %v568_v14 = vld [vmem:[#allocation6 + $0x8] sm:$0xff]  ;;  %v546_v17 = vld [vmem:[#allocation5] sm:$0xff]  ;;  %v547_v20 = vld [vmem:[#allocation5 + $0x8] sm:$0xff] }
 0x144   : > { %501 = vperm.xlu1 %944, %v486_v31   ;;  %492 = vperm.xlu0 %943, %v486_v31  }
 0x14c   : > { %945 = vset.pattern.permute.xlu0 %v1015_v29 }
 0x1ae   : > { %v499_v35 = vpop.permute.xlu1 %498  ;;  %v490_v36 = vpop.permute.xlu0 %489 }
 0x1af   : > { %v503_v37 = vsub.s32 %v496_v33, %v499_v35  ;;  %v494_v38 = vsub.s32 %v487_v34, %v490_v36 }
 0x1b1   : > { %v870_v39 = vxor.u32 2147483648, %v503_v37  ;;  %v868_v40 = vxor.u32 2147483648, %v494_v38 }
 0x1b3   : > { %vm513_vm7 = vcmp.le.s32.totalorder %v870_v39, 2147483650  ;;  %vm507_vm8 = vcmp.le.s32.totalorder %v868_v40, 2147483650 }
 0x1b4   : > { %vm517_vm9 = vmand %vm507_vm8, %vm513_vm7 }
 0x1b5   : > { %v521_v49 = vsel %vm517_vm9, %v519_v45, -1e+30 }
 0x1b6   : > { %v502_v41 = vpop.permute.xlu1 %501  ;;  %v493_v42 = vpop.permute.xlu0 %492 }
 0x1b7   : > { %v504_v43 = vsub.s32 %v496_v33, %v502_v41  ;;  %v495_v44 = vsub.s32 %v487_v34, %v493_v42 }
 0x1b9   : > { %v871_v46 = vxor.u32 2147483648, %v504_v43  ;;  %v869_v48 = vxor.u32 2147483648, %v495_v44 }
 0x1bb   : > { %vm516_vm10 = vcmp.le.s32.totalorder %v871_v46, 2147483650  ;;  %vm510_vm11 = vcmp.le.s32.totalorder %v869_v48, 2147483650 }
 0x1bc   : > { %vm518_vm12 = vmand %vm510_vm11, %vm516_vm10 }
 0x1bd   : > { %v522_v50 = vsel %vm518_vm12, %v520_v47, -1e+30 }
 0x1be   : > { %v523_v51 = vmax.f32 %v521_v49, %v522_v50 }
 0x1c0   : > { %v524_v52 = vrot.slane %v523_v51, 4 }
 0x1c2   : > { %v525_v53 = vmax.f32 %v523_v51, %v524_v52 }
 0x1c4   : > { %v526_v54 = vrot.slane %v525_v53, 2 }
 0x1c6   : > { %v527_v55 = vmax.f32 %v525_v53, %v526_v54 }
 0x1c8   : > { %v528_v56 = vrot.slane %v527_v55, 1 }
 0x1ca   : > { %v529_v57 = vmax.f32 %v527_v55, %v528_v56 }
 0x1cc   : > { %v530_v58 = vsub.f32 %v521_v49, %v529_v57  ;;  %v531_v59 = vsub.f32 %v522_v50, %v529_v57 }
 0x1ce   : > { %v534_v60 = vmul.f32 1.442695, %v531_v59  ;;  %v532_v61 = vmul.f32 1.442695, %v530_v58 }
 0x1d0   : > { %946 = vpow2.f32 %v534_v60 }
 0x1d1   : > { %948 = vpow2.f32 %v532_v61 }
 0x1d6   : > { %v947_v62 = vpop.eup %946 }
 0x1d7   : > { %v949_v63 = vpop.eup %948 }
 0x1d8   : > { %v536_v0 = vadd.f32 %v949_v63, %v947_v62 }
 0x1da   : > { %v537_v1 = vrot.slane %v536_v0, 4 }
 0x1dc   : > { %v538_v2 = vadd.f32 %v537_v1, %v536_v0 }
 0x1de   : > { %v539_v3 = vrot.slane %v538_v2, 2 }
 0x1e0   : > { %v540_v4 = vadd.f32 %v539_v3, %v538_v2 }
 0x1e2   : > { %v541_v5 = vrot.slane %v540_v4, 1 }
 0x1e4   : > { %v542_v6 = vadd.f32 %v541_v5, %v540_v4 }
 0x1e6   : > { %950 = vrcp.f32 %v542_v6 }
 0x1ec   : > { %v951_v7 = vpop.eup %950 }
 0x1ed   : > { %v544_v8 = vmul.f32 %v951_v7, %v949_v63  ;;  %v545_v9 = vmul.f32 %v951_v7, %v947_v62 }
 0x1ef   : > { %569 = vadd.xlane.f32.xlu2 %v544_v8  ;;  %v548_v10 = vpack.c.bf16 %v545_v9, %v544_v8 }
 0x1f1   : > { %557 = vmatmul.bf16.vlgmr.msra.gmra.mxu0 %v548_v10 }
 0x1f7   : > { %571 = vadd.xlane.f32.xlu2 %v545_v9 }
 0x262   : > { %v570_v12 = vpop.xlane.xlu2 %569 }
 0x263   : > { %v573_v13 = vadd.f32 %v570_v12, %v567_v11 }
 0x265   : > { %576 = vst.msk [vmem:[#allocation6] sm:$0xff] %vm575_vm13, %v573_v13 }
 0x26a   : > { %v572_v15 = vpop.xlane.xlu2 %571 }
 0x26b   : > { %v574_v16 = vadd.f32 %v572_v15, %v568_v14 }
 0x26d   : > { %577 = vst.msk [vmem:[#allocation6 + $0x8] sm:$0xff] %vm575_vm13, %v574_v16 }
 0x26e   : > { %v558_v18 = vpop.f32.mrf.mxu0 }
 0x26f   : > { %v563_v19 = vadd.f32 %v558_v18, %v546_v17 }
 0x271   : > { %565 = vst.msk [vmem:[#allocation5] sm:$0xff] %vm438_vm6, %v563_v19 }
 0x275   : > { %581 = sbr.rel (%p872_p2) target bundleno = 899 (0x383), region = 56 }
 0x276   : > { %v560_v21 = vpop.f32.mrf.mxu0 }
 0x277   : > { %v564_v23 = vadd.f32 %v560_v21, %v547_v20 }
 0x279   : > { %566 = vst.msk [vmem:[#allocation5 + $0x8] sm:$0xff] %vm438_vm6, %v564_v23 }
 0x27a   : > { %v584_v24 = vld [vmem:[#allocation6] sm:$0xff]  ;;  %v1017_v25 = vmov 0   ;;  %v585_v28 = vld [vmem:[#allocation6 + $0x8] sm:$0xff]  ;;  %v582_v41 = vld [vmem:[#allocation5] sm:$0xff]  ;;  %vm632_vm2 = vcmask 27648  }
 0x27b   : > { %952 = vset.pattern.permute.xlu0 %v1017_v25  ;;  %v586_v26 = vmax.f32 %v584_v24, 1e-16  ;;  %v587_v29 = vmax.f32 %v585_v28, 1e-16 }
 0x27d   : > { %590 = vperm.xlu0 %952, %v586_v26  }
 0x280   : > { %v583_v55 = vld [vmem:[#allocation5 + $0x8] sm:$0xff] }
 0x285   : > { %595 = vperm.xlu0 %952, %v587_v29  }
 0x2ef   : > { %v591_v30 = vpop.permute.xlu0 %590 }
 0x2f0   : > { %953 = vrcp.f32 %v591_v30  ;;  %v609_v35 = vand.u32 2147483648, %v591_v30  ;;  %v607_v37 = vand.u32 2147483647, %v591_v30  ;;  %vm603_vm15 = vweird.f32 %v591_v30 }
 0x2f2   : > { %v610_v40 = vor.u32 1.1754944e-38, %v609_v35  ;;  %vm608_vm1 = vcmp.eq.f32.partialorder %v607_v37, 8.507059e+37 }
 0x2f6   : > { %v954_v31 = vpop.eup %953 }
 0x2f7   : > { %v599_v32 = vmul.f32 %v954_v31, %v591_v30  ;;  %v596_v33 = vpop.permute.xlu0 %595  ;;  %vm604_vm14 = vweird.f32 %v954_v31 }
 0x2f8   : > { %955 = vrcp.f32 %v596_v33  ;;  %vm605_vm0 = vmor %vm603_vm15, %vm604_vm14  ;;  %v622_v47 = vand.u32 2147483647, %v596_v33  ;;  %v624_v48 = vand.u32 2147483648, %v596_v33  ;;  %vm618_vm4 = vweird.f32 %v596_v33 }
 0x2f9   : > { %v600_v34 = vsub.f32 1.0, %v599_v32 }
 0x2fa   : > { %v625_v54 = vor.u32 1.1754944e-38, %v624_v48  ;;  %vm623_vm7 = vcmp.eq.f32.partialorder %v622_v47, 8.507059e+37 }
 0x2fb   : > { %v601_v36 = vmul.f32 %v954_v31, %v600_v34 }
 0x2fd   : > { %v602_v38 = vadd.f32 %v954_v31, %v601_v36 }
 0x2fe   : > { %v956_v39 = vpop.eup %955 }
 0x2ff   : > { %v614_v42 = vmul.f32 %v956_v39, %v596_v33  ;;  %v606_v43 = vsel %vm605_vm0, %v954_v31, %v602_v38  ;;  %vm619_vm3 = vweird.f32 %v956_v39 }
 0x300   : > { %v611_v44 = vsel %vm608_vm1, %v610_v40, %v606_v43  ;;  %vm620_vm5 = vmor %vm618_vm4, %vm619_vm3 }
 0x301   : > { %v615_v45 = vsub.f32 1.0, %v614_v42  ;;  %v612_v46 = vmul.f32 %v611_v44, %v582_v41 }
 0x303   : > { %v616_v49 = vmul.f32 %v956_v39, %v615_v45  ;;  %v635_v50 = vmul.f32 %v612_v46, %v612_v46  ;;  %628 = vst.msk [vmem:[#allocation2] sm:$0xff] %vm438_vm6, %v612_v46  ;;  %v630_v51 = vpack.c.bf16 %v612_v46, %v612_v46 }
 0x305   : > { %v617_v52 = vadd.f32 %v956_v39, %v616_v49  ;;  %v637_v53 = vsel %vm438_vm6, %v635_v50, 0.0  ;;  %633 = vst.msk [vmem:[#allocation3] sm:$0xf] %vm632_vm2, %v630_v51 }
 0x306   : > { %638 = vadd.xlane.f32.xlu1 %v637_v53 }
 0x307   : > { %v621_v56 = vsel %vm620_vm5, %v956_v39, %v617_v52 }
 0x308   : > { %v626_v57 = vsel %vm623_vm7, %v625_v54, %v621_v56 }
 0x309   : > { %v627_v58 = vmul.f32 %v626_v57, %v583_v55 }
 0x30b   : > { %629 = vst.msk [vmem:[#allocation2 + $0x8] sm:$0xff] %vm438_vm6, %v627_v58  ;;  %v631_v59 = vpack.c.bf16 %v627_v58, %v627_v58  ;;  %v636_v60 = vmul.f32 %v627_v58, %v627_v58 }
 0x30d   : > { %634 = vst.msk [vmem:[#allocation3 + $0x4] sm:$0xf] %vm632_vm2, %v631_v59  ;;  %v640_v61 = vsel %vm438_vm6, %v636_v60, 0.0 }
 0x30e   : > { %641 = vadd.xlane.f32.xlu1 %v640_v61 }
 0x379   : > { %v639_v62 = vpop.xlane.xlu1 %638 }
 0x37a   : > { %643 = vst.msk [vmem:[#allocation4] sm:$0xff] %vm575_vm13, %v639_v62 }
 0x381   : > { %v642_v63 = vpop.xlane.xlu1 %641 }
 0x382   : > { %644 = vst.msk [vmem:[#allocation4 + $0x8] sm:$0xff] %vm575_vm13, %v642_v63 }
 0x383 PF: > { %p873_p3 = scmp.ne.s32.totalorder %s991_s22, 2 }
 0x384   : > { %p874_p4 = scmp.ne.s32.totalorder (!%p873_p3), %s987_s21, 1 }
 0x385   : > { %648 = sbr.rel (%p873_p3) target bundleno = 940 (0x3ac), region = 60 }
 0x38a   : > { %v649_v0 = vmin.f32 %v1156_v22, %v1158_v27  ;;  %v656_v2 = vlaneseq }
 0x38c   : > { %v650_v1 = vrot.slane %v649_v0, 4  ;;  %v657_v5 = vshrl.u32 %v656_v2, 7 }
 0x38e   : > { %v651_v3 = vmin.f32 %v649_v0, %v650_v1  ;;  %v658_v8 = vadd.s32 8, %v657_v5 }
 0x390   : > { %v652_v4 = vrot.slane %v651_v3, 2 }
 0x392   : > { %v653_v6 = vmin.f32 %v651_v3, %v652_v4 }
 0x394   : > { %v654_v7 = vrot.slane %v653_v6, 1 }
 0x396   : > { %v655_v9 = vmin.f32 %v653_v6, %v654_v7 }
 0x398   : > { %vm659_vm8 = vcmp.eq.f32.partialorder %v1156_v22, %v655_v9  ;;  %vm660_vm9 = vcmp.eq.f32.partialorder %v1158_v27, %v655_v9 }
 0x399   : > { %v661_v10 = vsel %vm659_vm8, %v657_v5, 16  ;;  %v662_v11 = vsel %vm660_vm9, %v658_v8, 16 }
 0x39a   : > { %vm663_vm10 = vcmp.lt.s32.totalorder %v661_v10, %v662_v11 }
 0x39b   : > { %v664_v12 = vsel %vm663_vm10, %v661_v10, %v662_v11 }
 0x39c   : > { %v665_v13 = vrot.slane %v664_v12, 4 }
 0x39e   : > { %vm666_vm11 = vcmp.lt.s32.totalorder %v664_v12, %v665_v13 }
 0x39f   : > { %v667_v14 = vsel %vm666_vm11, %v664_v12, %v665_v13 }
 0x3a0   : > { %v668_v15 = vrot.slane %v667_v14, 2 }
 0x3a2   : > { %vm669_vm12 = vcmp.lt.s32.totalorder %v667_v14, %v668_v15 }
 0x3a3   : > { %v670_v16 = vsel %vm669_vm12, %v667_v14, %v668_v15 }
 0x3a4   : > { %v671_v17 = vrot.slane %v670_v16, 1  ;;  %678 = sbr.rel (%p874_p4) target bundleno = 940 (0x3ac), region = 64 }
 0x3a6   : > { %vm672_vm13 = vcmp.lt.s32.totalorder %v670_v16, %v671_v17 }
 0x3a7   : > { %v673_v18 = vsel %vm672_vm13, %v670_v16, %v671_v17 }
 0x3a8   : > { %674 = vst [vmem:[%s387_s19] sm:$0x1] %v673_v18 }
 0x3a9   : > { %v679_v22 = vld [vmem:[#allocation2] sm:$0xff]  ;;  %v680_v27 = vld [vmem:[#allocation2 + $0x8] sm:$0xff] }
 0x3aa   : > { %681 = vst.msk [vmem:[%s1121_s29] sm:$0xff] %vm438_vm6, %v679_v22 }
 0x3ab   : > { %682 = vst.msk [vmem:[%s1121_s29 + $0x8] sm:$0xff] %vm438_vm6, %v680_v27 }
 0x3ac PF: > { %s17_s27 = sadd.s32 1, %s1011_s27   ;;  %s1228_s10 = sld [smem:[#allocation7_spill]] }
 0x3ad   : > { %p14_p5 = scmp.ge.s32.totalorder %s17_s27, 14   ;;  %s1229_s11 = sld [smem:[#allocation8_spill]] }
 0x3ae   : > { %s1230_s21 = smov %s999_s24  ;;  %s1231_s22 = smov %s1003_s25 }
 0x3af   : > { %s1232_s23 = smov %s1007_s26  ;;  %s1233_s24 = smov %s1237_s28 }
 0x3b0   :  { %16 = sbr.rel (!%p14_p5) target bundleno = 4 (0x4), region = 115 }
 0x3b2   : > { %s1234_s25 = smov %s1228_s10 }
 0x3b3   : > { %s1235_s26 = smov %s1229_s11 }

</bundles_post_ra>
